<compile_context>
chip_gen: v7x
topology: tpu7x:2x2x1
jax: 0.10.0
libtpu: 0.0.40
codegen_flags: <defaults>
</compile_context>

<pallas_src>
import functools
import math

import jax
import jax.numpy as jnp
from jax.experimental import pallas as pl
from jax.experimental.pallas import tpu as pltpu

LANES = 128            # vreg lane width
F32_SUBLANES = 8       # f32 sublane count
MAX_TILE_R_REDUCE = 8192   # (8192,128) f32 = 4 MiB per input block
MAX_TILE_R_NONE = 4096     # 'none' keeps 3 live arrays -> 2 MiB blocks
X_FILL = -1e4          # pad logit: tanh saturates, log(1)=0 -> padded loss is 0


def _sublane_multiple(dtype):
    """Native packed-tile sublane multiple: 8 (4B), 16 (2B), 32 (1B)."""
    itemsize = jnp.dtype(dtype).itemsize
    if itemsize >= 4:
        return F32_SUBLANES
    return F32_SUBLANES * (4 // itemsize)


def _vmem_limit_bytes(per_step_bytes):
    """Double-buffered pipeline blocks + headroom, clamped to v7x physical VMEM."""
    need = 2 * per_step_bytes + (8 << 20)
    return int(min(64 << 20, max(16 << 20, need)))


def _focal_terms(x, t, alpha, gamma):
    """Elementwise focal loss in f32 (stable BCE-with-logits, minimal EUP/VALU).

    tanh-based sigmoid: 2 transcendentals/element (tanh, log), no f32 divide:
      sigmoid(|x|)      = 0.5 + 0.5*tanh(|x|/2)
      log1p(exp(-|x|))  = -log(sigmoid(|x|))
    """
    x = x.astype(jnp.float32)
    t = t.astype(jnp.float32)

    p_abs = 0.5 + 0.5 * jnp.tanh(0.5 * jnp.abs(x))     # sigmoid(|x|)
    p = jnp.where(x >= 0, p_abs, 1.0 - p_abs)          # sigmoid(x)
    ce = jnp.maximum(x, 0.0) - x * t - jnp.log(p_abs)  # BCE-with-logits

    q = p + t - 2.0 * p * t                            # == 1 - p_t
    if gamma == 2.0:
        focal = q * q                                  # avoid exp/log of power
    elif gamma == 1.0:
        focal = q
    elif gamma == 0.0:
        focal = jnp.ones_like(q)
    else:
        focal = jnp.power(q, gamma)
    loss = ce * focal

    if alpha >= 0:
        # alpha*t + (1-alpha)*(1-t) == (1-alpha) + (2*alpha-1)*t
        loss = ((1.0 - alpha) + (2.0 * alpha - 1.0) * t) * loss
    return loss


def _focal_partial_sum_kernel(x_ref, t_ref, psum_ref, *, alpha, gamma,
                              tile_r, valid_rows):
    """One block -> sublane-aligned (8,128) partial sums; final reduce in XLA."""
    loss = _focal_terms(x_ref[...], t_ref[...], alpha, gamma)
    if valid_rows is not None:
        # Ragged last grid block: rows >= valid_rows hold unspecified data.
        row = (pl.program_id(0) * tile_r
               + jax.lax.broadcasted_iota(jnp.int32, loss.shape, 0))
        loss = jnp.where(row < valid_rows, loss, 0.0)
    psum_ref[...] = jnp.sum(
        loss.reshape(tile_r // F32_SUBLANES, F32_SUBLANES, LANES), axis=0)


def _focal_elementwise_kernel(x_ref, t_ref, o_ref, *, alpha, gamma):
    o_ref[...] = _focal_terms(x_ref[...], t_ref[...], alpha, gamma).astype(o_ref.dtype)


def sigmoid_focal_loss_pallas(inputs, targets, alpha=0.25, gamma=2.0,
                              reduction="mean", max_tile_rows=None):
    assert inputs.shape == targets.shape
    if reduction not in ("mean", "sum", "none"):
        raise ValueError(f"unsupported reduction: {reduction}")
    orig_shape = inputs.shape
    orig_dtype = inputs.dtype
    n = math.prod(orig_shape)

    # --- block geometry ------------------------------------------------------
    sub = max(_sublane_multiple(inputs.dtype), _sublane_multiple(targets.dtype))
    if max_tile_rows is None:
        max_tile_rows = MAX_TILE_R_NONE if reduction == "none" else MAX_TILE_R_REDUCE
    max_tile_rows = max(sub, (max_tile_rows // sub) * sub)

    rows_needed = pl.cdiv(n, LANES)
    # Aim for >=4 grid blocks (keeps both v7x TCs busy) within the VMEM-sized cap.
    tile_r = min(max_tile_rows, max(sub, ((rows_needed // 4) // sub) * sub))
    rows = max(rows_needed, tile_r)
    num_blocks = pl.cdiv(rows, tile_r)
    ragged = (rows % tile_r) != 0

    x_flat = inputs.reshape(-1)
    t_flat = targets.reshape(-1)
    n_slab = rows * LANES
    if n_slab != n:
        # Only lane-misaligned (n % 128 != 0) or tiny inputs pay this copy;
        # aligned inputs are reshaped in place (ragged last block is masked).
        # Padding is inert: x=-1e4, t=0 gives exactly zero loss.
        # TODO(synk): for huge lane-misaligned inputs, handle the <128-element
        # tail in plain JAX instead of padding the whole tensor.
        x_flat = jnp.pad(x_flat, (0, n_slab - n), constant_values=X_FILL)
        t_flat = jnp.pad(t_flat, (0, n_slab - n), constant_values=0)
    x2 = x_flat.reshape(rows, LANES)
    t2 = t_flat.reshape(rows, LANES)

    grid = (num_blocks,)
    in_specs = [
        pl.BlockSpec((tile_r, LANES), lambda i: (i, 0)),
        pl.BlockSpec((tile_r, LANES), lambda i: (i, 0)),
    ]
    in_block_bytes = tile_r * LANES * (x2.dtype.itemsize + t2.dtype.itemsize)

    if reduction in ("mean", "sum"):
        kernel = functools.partial(_focal_partial_sum_kernel, alpha=alpha,
                                   gamma=gamma, tile_r=tile_r,
                                   valid_rows=rows if ragged else None)
        out_block_bytes = F32_SUBLANES * LANES * 4
        partials = pl.pallas_call(
            kernel,
            out_shape=jax.ShapeDtypeStruct((num_blocks * F32_SUBLANES, LANES),
                                           jnp.float32),
            grid_spec=pltpu.PrefetchScalarGridSpec(
                num_scalar_prefetch=0,
                grid=grid,
                in_specs=in_specs,
                out_specs=pl.BlockSpec((F32_SUBLANES, LANES), lambda i: (i, 0)),
            ),
            compiler_params=pltpu.CompilerParams(
                dimension_semantics=("parallel",),
                vmem_limit_bytes=_vmem_limit_bytes(in_block_bytes + out_block_bytes)),
        )(x2, t2)
        total = jnp.sum(partials)      # tiny (num_blocks*8, 128) reduce in XLA
        if reduction == "mean":
            total = total / float(n)
        return total.astype(orig_dtype)

    else:  # 'none'
        kernel = functools.partial(_focal_elementwise_kernel, alpha=alpha,
                                   gamma=gamma)
        out_block_bytes = tile_r * LANES * jnp.dtype(orig_dtype).itemsize
        out = pl.pallas_call(
            kernel,
            out_shape=jax.ShapeDtypeStruct((rows, LANES), orig_dtype),
            grid_spec=pltpu.PrefetchScalarGridSpec(
                num_scalar_prefetch=0,
                grid=grid,
                in_specs=in_specs,
                out_specs=pl.BlockSpec((tile_r, LANES), lambda i: (i, 0)),
            ),
            compiler_params=pltpu.CompilerParams(
                dimension_semantics=("parallel",),
                vmem_limit_bytes=_vmem_limit_bytes(in_block_bytes + out_block_bytes)),
        )(x2, t2)
        out = out.reshape(-1)
        if n_slab != n:
            out = out[:n]
        return out.reshape(orig_shape)


class SigmoidFocalLoss:
    """JAX/Pallas port of mdl.infer_utils.loss.SigmoidFocalLoss (no params)."""

    def __init__(self, alpha: float = 0.25, gamma: float = 2.0,
                 reduction: str = "mean"):
        self.alpha = alpha
        self.gamma = gamma
        self.reduction = reduction

    def __call__(self, inputs, targets):
        return sigmoid_focal_loss_pallas(inputs, targets, alpha=self.alpha,
                                         gamma=self.gamma,
                                         reduction=self.reduction)


def _reference(inputs, targets, alpha=0.25, gamma=2.0, reduction="mean"):
    """Plain-JAX reference following the torchvision formula (independent path)."""
    x = inputs.astype(jnp.float32)
    t = targets.astype(jnp.float32)
    p = jax.nn.sigmoid(x)
    ce = jnp.maximum(x, 0.0) - x * t + jnp.log1p(jnp.exp(-jnp.abs(x)))
    p_t = p * t + (1.0 - p) * (1.0 - t)
    loss = ce * (1.0 - p_t) ** gamma
    if alpha >= 0:
        loss = (alpha * t + (1.0 - alpha) * (1.0 - t)) * loss
    if reduction == "mean":
        return loss.mean()
    if reduction == "sum":
        return loss.sum()
    return loss


if __name__ == "__main__":
    key = jax.random.PRNGKey(0)
    k1, k2, k3, k4, k5, k6 = jax.random.split(key, 6)

    # Typical detection-style logits/targets: NCHW, binary targets.
    x = jax.random.normal(k1, (2, 4, 16, 16), dtype=jnp.float32) * 2.0
    t = jax.random.bernoulli(k2, p=0.3, shape=(2, 4, 16, 16)).astype(jnp.float32)

    mod = SigmoidFocalLoss(alpha=0.25, gamma=2.0, reduction="mean")
    out = mod(x, t)
    jax.block_until_ready(out)
    ref = _reference(x, t, 0.25, 2.0, "mean")
    assert jnp.allclose(out, ref, rtol=2e-5, atol=1e-5), (out, ref)

    # 'sum' and 'none'.
    out_sum = sigmoid_focal_loss_pallas(x, t, reduction="sum")
    out_none = sigmoid_focal_loss_pallas(x, t, reduction="none")
    jax.block_until_ready((out_sum, out_none))
    assert jnp.allclose(out_sum, _reference(x, t, reduction="sum"),
                        rtol=2e-5, atol=1e-4)
    assert jnp.allclose(out_none, _reference(x, t, reduction="none"),
                        rtol=1e-4, atol=1e-6)

    # Lane-misaligned shape -> inert-padding (+ masked ragged block) path.
    xo = jax.random.normal(k3, (3, 5, 7, 11), dtype=jnp.float32)
    to = jax.random.bernoulli(k4, p=0.5, shape=(3, 5, 7, 11)).astype(jnp.float32)
    out_odd = sigmoid_focal_loss_pallas(xo, to, reduction="mean")
    jax.block_until_ready(out_odd)
    assert jnp.allclose(out_odd, _reference(xo, to, reduction="mean"),
                        rtol=2e-5, atol=1e-5)

    # Lane-aligned but ragged last grid block (no padding, in-kernel mask).
    xr = jax.random.normal(k5, (36, 128), dtype=jnp.float32)
    tr = jax.random.bernoulli(k6, p=0.4, shape=(36, 128)).astype(jnp.float32)
    out_rag = sigmoid_focal_loss_pallas(xr, tr, reduction="sum")
    out_rag_none = sigmoid_focal_loss_pallas(xr, tr, reduction="none")
    jax.block_until_ready((out_rag, out_rag_none))
    assert jnp.allclose(out_rag, _reference(xr, tr, reduction="sum"),
                        rtol=2e-5, atol=1e-4)
    assert jnp.allclose(out_rag_none, _reference(xr, tr, reduction="none"),
                        rtol=1e-4, atol=1e-6)

    # Force multiple grid blocks (parallel partial-sum path) with a tiny tile.
    out_multi = sigmoid_focal_loss_pallas(x, t, reduction="mean", max_tile_rows=8)
    jax.block_until_ready(out_multi)
    assert jnp.allclose(out_multi, ref, rtol=2e-5, atol=1e-5)

    # bf16 inputs stay bf16 on the wire (f32 math only inside the kernel).
    xb = (jax.random.normal(k1, (4, 512)) * 2.0).astype(jnp.bfloat16)
    tb = jax.random.bernoulli(k2, p=0.3, shape=(4, 512)).astype(jnp.bfloat16)
    out_b = sigmoid_focal_loss_pallas(xb, tb, reduction="mean")
    jax.block_until_ready(out_b)
    assert jnp.allclose(out_b.astype(jnp.float32), _reference(xb, tb),
                        rtol=2e-2, atol=1e-3)

    print("KERNEL_OK")
</pallas_src>

<mosaic_0001>
module attributes {stable_mosaic.version = 11 : i64} {
  func.func @_focal_partial_sum_kernel(%arg0: i32, %arg1: memref<8x128xf32, #tpu.memory_space<vmem>>, %arg2: memref<8x128xf32, #tpu.memory_space<vmem>>, %arg3: memref<8x128xf32, #tpu.memory_space<vmem>>) attributes {dimension_semantics = [#tpu.dimension_semantics<parallel>], iteration_bounds = array<i64: 2>, scalar_prefetch = 0 : i64, scratch_operands = 0 : i64, tpu.core_type = #tpu.core_type<tc>, window_params = [{transform_indices = @transform_0, window_bounds = array<i64: 8, 128>}, {transform_indices = @transform_1, window_bounds = array<i64: 8, 128>}, {transform_indices = @transform_2, window_bounds = array<i64: 8, 128>}]} {
    %c0 = arith.constant 0 : index
    %c0_0 = arith.constant 0 : index
    %0 = vector.load %arg1[%c0, %c0_0] : memref<8x128xf32, #tpu.memory_space<vmem>>, vector<8x128xf32>
    %c0_1 = arith.constant 0 : index
    %c0_2 = arith.constant 0 : index
    %1 = vector.load %arg2[%c0_1, %c0_2] : memref<8x128xf32, #tpu.memory_space<vmem>>, vector<8x128xf32>
    %2 = math.absf %0 : vector<8x128xf32>
    %cst = arith.constant 5.000000e-01 : f32
    %3 = vector.broadcast %cst : f32 to vector<8x128xf32>
    %4 = arith.mulf %3, %2 : vector<8x128xf32>
    %5 = math.tanh %4 : vector<8x128xf32>
    %cst_3 = arith.constant 5.000000e-01 : f32
    %6 = vector.broadcast %cst_3 : f32 to vector<8x128xf32>
    %7 = arith.mulf %6, %5 : vector<8x128xf32>
    %cst_4 = arith.constant 5.000000e-01 : f32
    %8 = vector.broadcast %cst_4 : f32 to vector<8x128xf32>
    %9 = arith.addf %8, %7 : vector<8x128xf32>
    %cst_5 = arith.constant 0.000000e+00 : f32
    %10 = vector.broadcast %cst_5 : f32 to vector<8x128xf32>
    %11 = arith.cmpf oge, %0, %10 : vector<8x128xf32>
    %cst_6 = arith.constant 1.000000e+00 : f32
    %12 = vector.broadcast %cst_6 : f32 to vector<8x128xf32>
    %13 = arith.subf %12, %9 : vector<8x128xf32>
    %14 = arith.select %11, %9, %13 : vector<8x128xi1>, vector<8x128xf32>
    %cst_7 = arith.constant 0.000000e+00 : f32
    %15 = vector.broadcast %cst_7 : f32 to vector<8x128xf32>
    %16 = arith.maximumf %0, %15 : vector<8x128xf32>
    %17 = arith.mulf %0, %1 : vector<8x128xf32>
    %18 = arith.subf %16, %17 : vector<8x128xf32>
    %19 = math.log %9 : vector<8x128xf32>
    %20 = arith.subf %18, %19 : vector<8x128xf32>
    %21 = arith.addf %14, %1 : vector<8x128xf32>
    %cst_8 = arith.constant 2.000000e+00 : f32
    %22 = vector.broadcast %cst_8 : f32 to vector<8x128xf32>
    %23 = arith.mulf %22, %14 : vector<8x128xf32>
    %24 = arith.mulf %23, %1 : vector<8x128xf32>
    %25 = arith.subf %21, %24 : vector<8x128xf32>
    %26 = arith.mulf %25, %25 : vector<8x128xf32>
    %27 = arith.mulf %20, %26 : vector<8x128xf32>
    %cst_9 = arith.constant -5.000000e-01 : f32
    %28 = vector.broadcast %cst_9 : f32 to vector<8x128xf32>
    %29 = arith.mulf %28, %1 : vector<8x128xf32>
    %cst_10 = arith.constant 7.500000e-01 : f32
    %30 = vector.broadcast %cst_10 : f32 to vector<8x128xf32>
    %31 = arith.addf %30, %29 : vector<8x128xf32>
    %32 = arith.mulf %31, %27 : vector<8x128xf32>
    %33 = vector.shape_cast %32 : vector<8x128xf32> to vector<1x8x128xf32>
    %cst_11 = arith.constant dense<0.000000e+00> : vector<8x128xf32>
    %34 = vector.multi_reduction <add>, %33, %cst_11 [0] : vector<1x8x128xf32> to vector<8x128xf32>
    %c0_12 = arith.constant 0 : index
    %c0_13 = arith.constant 0 : index
    %35 = vector.load %arg3[%c0_12, %c0_13] : memref<8x128xf32, #tpu.memory_space<vmem>>, vector<8x128xf32>
    tpu.vector_store %arg3[%c0_12, %c0_13], %34 {strides = array<i32>} : memref<8x128xf32, #tpu.memory_space<vmem>>, vector<8x128xf32>,
    return
  }
  func.func @transform_0(%arg0: i32) -> (i32, i32) {
    %c0_i32 = arith.constant 0 : i32
    %c0_i32_0 = arith.constant 0 : i32
    return %arg0, %c0_i32 : i32, i32
  }
  func.func @transform_1(%arg0: i32) -> (i32, i32) {
    %c0_i32 = arith.constant 0 : i32
    %c0_i32_0 = arith.constant 0 : i32
    return %arg0, %c0_i32 : i32, i32
  }
  func.func @transform_2(%arg0: i32) -> (i32, i32) {
    %c0_i32 = arith.constant 0 : i32
    %c0_i32_0 = arith.constant 0 : i32
    return %arg0, %c0_i32 : i32, i32
  }
}

</mosaic_0001>

<bundles_post_ra>
// kernel: tpu_custom_call.1
= control target key start
LH: loop header
LB: loop body
LE: loop exit
PB: predicated region body
PF: predicated region fallthrough
CT: control target
= control target key end

     0   :  { %7 = vsyncpa [#allocation3], 0  ;;  %s764_s0 = inlined_call_operand.hbm [shape: f32[16,128], index: 0, kind: input, shape index: {}]   ;;  %s765_s1 = inlined_call_operand.hbm [shape: f32[16,128], index: 1, kind: input, shape index: {}]   ;;  %s766_s2 = inlined_call_operand.hbm [shape: f32[16,128], index: 2, kind: output, shape index: {}]  }
   0x1   :  { %9 = vsyncpa [#allocation3 + $0x1], 0 }
   0x2   :  { %10 = vsyncpa [#allocation6], 0 }
   0x3   :  { %12 = vsyncpa [#allocation6 + $0x1], 0 }
   0x4   :  { %13 = vsyncpa [#allocation4], 0 }
   0x5   :  { %15 = vsyncpa [#allocation4 + $0x1], 0  ;;  %s550_s9 = smov 0   ;;  %s552_s10 = smov 0  }
   0x6   :  { %s554_s11 = smov 0   ;;  %s556_s12 = smov 0  }
   0x7 LB: > { %s571_s13 = sadd.s32 4294967295, %s530_s12   ;;  %s330_s14 = sadd.s32 4294967294, %s530_s12   ;;  %s530_s12 = sphi %s556_s12, %s785_s12   ;;  %s526_s11 = sphi %s554_s11, %s784_s11   ;;  %s522_s10 = sphi %s552_s10, %s783_s10   ;;  %s518_s9 = sphi %s550_s9, %s782_s9  }
   0x8   : > { %s575_s15 = sadd.s32 1, %s530_s12   ;;  %s28_s16 = sadd.s32 1, %s526_s11 }
   0x9   : > { %s25_s17 = ssub.s32 %s530_s12, %s575_s15  ;;  %p35_p0 = scmp.ne.s32.totalorder %s526_s11, %s522_s10 }
   0xa   : > { %p26_p1 = scmp.eq.s32.totalorder %s25_s17, 0  ;;  %p36_p2 = scmp.eq.s32.totalorder %s530_s12, 0 }
   0xb   : > { %p41_p3 = scmp.ne.s32.totalorder %s522_s10, %s518_s9  ;;  %p42_p4 = scmp.eq.s32.totalorder %s571_s13, 0 }
   0xc   : > { %s587_s18 = scalar_select %p26_p1, %s526_s11, %s28_s16  }
   0xd   : > { %p589_p5 = por %p36_p2, %p35_p0  ;;  %p593_p6 = por %p42_p4, %p41_p3 }
   0xe   : > { %p91_p7 = scmp.eq.s32.totalorder %s571_s13, 1  ;;  %p97_p8 = scmp.eq.s32.totalorder %s330_s14, 1 }
   0xf   : > { %s770_s20 = scalar_select %p593_p6, 1, 0 }
  0x10   : > { %p362_p10 = scmp.lt.s32.totalorder %s530_s12, 2  ;;  %p600_p11 = por %p91_p7, %p35_p0 }
  0x11   : > { %p604_p12 = por %p97_p8, %p41_p3  ;;  %s609_s23 = sand.u32 1, %s526_s11  }
  0x12   : > { %s771_s21 = scalar_select %p600_p11, 1, 0 }
  0x13   : > { %s772_s22 = scalar_select %p604_p12, 1, 0 }
  0x14   : > { %s334_s24 = sshll.u32 %s530_s12, 7  ;;  %s333_s25 = sshll.u32 %s609_s23, 3 }
  0x15   : > { %s618_s28 = scalar_lea.hbm %s764_s0, %s334_s24  ;;  %s121_s29 = scalar_lea.vmem [#allocation2], %s333_s25 }
  0x16   : > { %s128_s30 = sshll.u32 %s121_s29, 4  ;;  %p624_p13 = pnand %p362_p10, %p589_p5  ;;  %s628_s30 = int_to_ptr.vmem [resolvable:$true] %s128_s30 }
  0x17   : > { %s118_s4 = scalar_lea.sflag [#allocation3], %s609_s23  ;;  %s400_s5 = scalar_lea.hbm %s618_s28, 128 }
  0x18   : > { %p401_p2 = scmp.ne.s32.totalorder %s618_s28, %s400_s5  ;;  %p402_p3 = pneg %p624_p13 }
  0x19   : > { %s405_s8 = scalar_lea.hbm %s764_s0, 256  ;;  %p406_p5 = scmp.lt.u32.totalorder %s618_s28, %s764_s0 }
  0x1a   : > { %p403_p4 = pnand %p402_p3, %p401_p2  ;;  %p407_p8 = scmp.lt.u32.totalorder %s405_s8, %s400_s5 }
  0x1b   : > { %p409_p9 = scmp.lt.u32.totalorder %s400_s5, %s618_s28 }
  0x1c   : > { %p404_p7 = pneg %p403_p4  ;;  %p408_p10 = por %p407_p8, %p406_p5 }
  0x1e   : > { %p410_p0 = por %p409_p9, %p408_p10 }
  0x20   : > { %p411_p1 = pnand %p410_p0, %p404_p7 }
  0x22   : > { %414 = shalt.err (!%p411_p1)
}
  0x23   : > { %s415_s17 = scalar_lea.vmem %s628_s30, 128  ;;  %s532_s19 = smov [#allocation2]  }
  0x24   : > { %p416_p2 = scmp.ne.s32.totalorder %s628_s30, %s415_s17  ;;  %s420_s26 = sshll.u32 %s532_s19, 4  ;;  %s421_s26 = int_to_ptr.vmem [resolvable:$false] %s420_s26 }
  0x25   : > { %s422_s27 = scalar_lea.vmem %s421_s26, 256  ;;  %p423_p11 = scmp.lt.s32.totalorder %s628_s30, %s421_s26 }
  0x26   : > { %p418_p4 = pnand %p416_p2, %p402_p3  ;;  %p424_p5 = scmp.lt.s32.totalorder %s422_s27, %s415_s17 }
  0x28   : > { %p419_p12 = pneg %p418_p4  ;;  %p425_p8 = por %p424_p5, %p423_p11 }
  0x2a   : > { %p426_p9 = pnand %p425_p8, %p419_p12 }
  0x2c   : > { %429 = shalt.err (!%p426_p9)
}
  0x2d   : > { %354 = dma.hbm_to_vmem [thread:$0]  (!%p624_p13), %s618_s28, 128, %s628_s30, %s118_s4  }
  0x2e   : > { %p774_p0 = scmp.lt.s32.totalorder %s530_s12, 3  ;;  %p775_p1 = scmp.ge.s32.totalorder %s530_s12, 1 }
  0x2f   : > { %s671_s7 = scalar_lea.hbm %s765_s1, %s334_s24  ;;  %s139_s8 = scalar_lea.vmem [#allocation5], %s333_s25 }
  0x30   : > { %p662_p7 = pnand %p775_p1, %p774_p0  ;;  %s146_s14 = sshll.u32 %s139_s8, 4  ;;  %s147_s14 = int_to_ptr.vmem [resolvable:$true] %s146_s14 }
  0x31   : > { %s136_s28 = scalar_lea.sflag [#allocation6], %s609_s23  ;;  %s430_s30 = scalar_lea.hbm %s671_s7, 128 }
  0x32   : > { %s776_s29 = scalar_select %p662_p7, 1, 0 }
  0x33   : > { %p431_p11 = scmp.ne.s32.totalorder %s671_s7, %s430_s30  ;;  %s435_s24 = scalar_lea.hbm %s765_s1, 256 }
  0x34   : > { %p436_p2 = scmp.lt.u32.totalorder %s671_s7, %s765_s1  ;;  %p437_p4 = scmp.lt.u32.totalorder %s435_s24, %s430_s30 }
  0x35   : > { %p433_p12 = pnand %p431_p11, %p402_p3  ;;  %p439_p8 = scmp.lt.u32.totalorder %s430_s30, %s671_s7 }
  0x36   : > { %p438_p5 = por %p437_p4, %p436_p2 }
  0x37   : > { %p434_p10 = pneg %p433_p12 }
  0x38   : > { %p440_p9 = por %p439_p8, %p438_p5 }
  0x3a   : > { %p441_p0 = pnand %p440_p9, %p434_p10 }
  0x3c   : > { %444 = shalt.err (!%p441_p0)
}
  0x3d   : > { %s445_s23 = scalar_lea.vmem %s147_s14, 128  ;;  %s533_s25 = smov [#allocation5]  }
  0x3e   : > { %p446_p1 = scmp.ne.s32.totalorder %s147_s14, %s445_s23  ;;  %s450_s26 = sshll.u32 %s533_s25, 4  ;;  %s451_s26 = int_to_ptr.vmem [resolvable:$false] %s450_s26 }
  0x3f   : > { %s452_s27 = scalar_lea.vmem %s451_s26, 256  ;;  %p453_p6 = scmp.lt.s32.totalorder %s147_s14, %s451_s26 }
  0x40   : > { %p448_p11 = pnand %p446_p1, %p402_p3  ;;  %p454_p7 = scmp.lt.s32.totalorder %s452_s27, %s445_s23 }
  0x42   : > { %p449_p12 = pneg %p448_p11  ;;  %p455_p2 = por %p454_p7, %p453_p6 }
  0x44   : > { %p456_p4 = pnand %p455_p2, %p449_p12 }
  0x46   : > { %459 = shalt.err (!%p456_p4)
}
  0x47   : > { %357 = dma.hbm_to_vmem [thread:$0]  (!%p624_p13), %s671_s7, 128, %s147_s14, %s136_s28  }
  0x48   : > { %p777_p10 = scmp.ne.s32.totalorder %s776_s29, 0 }
  0x49   : > { %s698_s5 = sand.u32 (!%p777_p10), 1, %s522_s10   ;;  %p778_p6 = scmp.ne.s32.totalorder (!%p777_p10), %s770_s20, 0 }
  0x4a   : > { %155 = sbr.rel (%p777_p10) target bundleno = 137 (0x89), region = 28  ;;  %s701_s6 = sshll.u32 (!%p777_p10), %s698_s5, 3 }
  0x4b   : > { %s158_s8 = scalar_lea.sflag (!%p777_p10), [#allocation3], %s698_s5  ;;  %s161_s30 = scalar_lea.vmem (!%p777_p10), [#allocation2], %s701_s6 }
  0x51   : > { %505 = dma.done.wait (%p778_p6), %s158_s8, 128  }
  0x52   : > { %507 = vsyncadd (%p778_p6), %s158_s8, 4294967168  ;;  %s167_s3 = scalar_lea.sflag [#allocation6], %s698_s5  ;;  %s170_s29 = scalar_lea.vmem [#allocation5], %s701_s6 }
  0x53   : > { %509 = dma.done.wait (%p778_p6), %s167_s3, 128  }
  0x54   : > { %511 = vsyncadd (%p778_p6), %s167_s3, 4294967168  ;;  %v196_v0 = vld [vmem:[%s161_s30] sm:$0xff]  ;;  %v197_v6 = vld [vmem:[%s170_s29] sm:$0xff]  ;;  %s195_s20 = scalar_lea.vmem [#allocation7], %s701_s6  ;;  %s342_s14 = sshll.u32 %s571_s13, 7 }
  0x55   : > { %v198_v1 = vand.u32 2147483647, %v196_v0  ;;  %vm203_vm0 = vcmp.ge.f32.partialorder %v196_v0, 0.0  ;;  %v206_v11 = vmax.f32 %v196_v0, 0.0  ;;  %v207_v12 = vmul.f32 %v197_v6, %v196_v0  ;;  %s237_s7 = sshll.u32 %s195_s20, 4  ;;  %s722_s16 = scalar_lea.hbm %s766_s2, %s342_s14  ;;  %s717_s7 = int_to_ptr.vmem [resolvable:$true] %s237_s7 }
  0x56   : > { %v218_v16 = vmul.f32 -0.5, %v197_v6  ;;  %s224_s24 = scalar_lea.sflag [#allocation4], %s698_s5  ;;  %s460_s17 = scalar_lea.vmem %s717_s7, 128 }
  0x57   : > { %v199_v2 = vmul.f32 0.5, %v198_v1  ;;  %v208_v15 = vsub.f32 %v206_v11, %v207_v12  ;;  %p461_p13 = scmp.ne.s32.totalorder %s717_s7, %s460_s17  ;;  %p779_p3 = scmp.ne.s32.totalorder %s771_s21, 0 }
  0x58   : > { %v219_v21 = vadd.f32 0.75, %v218_v16  ;;  %s534_s13 = smov [#allocation7]  }
  0x59   : > { %396 = vtanh.f32 %v199_v2  ;;  %p462_p7 = pnand %p461_p13, %p779_p3  ;;  %s464_s19 = sshll.u32 %s534_s13, 4  ;;  %s465_s19 = int_to_ptr.vmem [resolvable:$false] %s464_s19 }
  0x5a   : > { %s466_s23 = scalar_lea.vmem %s465_s19, 256  ;;  %p467_p8 = scmp.lt.s32.totalorder %s717_s7, %s465_s19 }
  0x5b   : > { %p463_p5 = pneg %p462_p7  ;;  %p468_p9 = scmp.lt.s32.totalorder %s466_s23, %s460_s17 }
  0x5d   : > { %p469_p0 = por %p468_p9, %p467_p8 }
  0x5f   : > { %p470_p1 = pnand %p469_p0, %p463_p5 }
  0x63   : > { %v397_v3 = vpop.eup %396 }
  0x64   : > { %v201_v4 = vmul.f32 0.5, %v397_v3 }
  0x66   : > { %v202_v5 = vadd.f32 0.5, %v201_v4 }
  0x68   : > { %v204_v7 = vsub.f32 1.0, %v202_v5  ;;  %398 = vlog2.f32 %v202_v5 }
  0x6a   : > { %v205_v8 = vsel %vm203_vm0, %v202_v5, %v204_v7 }
  0x6b   : > { %v212_v9 = vadd.f32 %v205_v8, %v197_v6  ;;  %v213_v10 = vmul.f32 2.0, %v205_v8 }
  0x6d   : > { %v214_v13 = vmul.f32 %v213_v10, %v197_v6 }
  0x6f   : > { %v215_v14 = vsub.f32 %v212_v9, %v214_v13 }
  0x71   : > { %v216_v19 = vmul.f32 %v215_v14, %v215_v14 }
  0x72   : > { %v399_v17 = vpop.eup %398 }
  0x73   : > { %v210_v18 = vmul.f32 0.6931472, %v399_v17 }
  0x75   : > { %v211_v20 = vsub.f32 %v208_v15, %v210_v18 }
  0x77   : > { %v217_v22 = vmul.f32 %v216_v19, %v211_v20 }
  0x79   : > { %v220_v23 = vmul.f32 %v219_v21, %v217_v22 }
  0x7b   : > { %222 = vst [vmem:[%s195_s20] sm:$0xff] %v220_v23 }
  0x7c   : > { %473 = shalt.err (!%p470_p1)
}
  0x7d   : > { %s474_s25 = scalar_lea.hbm %s722_s16, 128  ;;  %s478_s5 = scalar_lea.hbm %s766_s2, 256 }
  0x7e   : > { %p475_p11 = scmp.ne.s32.totalorder %s722_s16, %s474_s25  ;;  %p479_p4 = scmp.lt.u32.totalorder %s722_s16, %s766_s2 }
  0x7f   : > { %p480_p10 = scmp.lt.u32.totalorder %s478_s5, %s474_s25  ;;  %p482_p13 = scmp.lt.u32.totalorder %s474_s25, %s722_s16 }
  0x80   : > { %p476_p12 = pnand %p475_p11, %p779_p3 }
  0x81   : > { %p481_p6 = por %p480_p10, %p479_p4 }
  0x82   : > { %p477_p2 = pneg %p476_p12 }
  0x83   : > { %p483_p7 = por %p482_p13, %p481_p6 }
  0x85   : > { %p484_p5 = pnand %p483_p7, %p477_p2 }
  0x87   : > { %487 = shalt.err (!%p484_p5)
}
  0x88   : > { %349 = dma.vmem_to_hbm [thread:$0]  (%p779_p3), %s717_s7, 128, %s722_s16, %s224_s24  }
  0x89 PF: > { %s249_s30 = sand.u32 1, %s518_s9   ;;  %p780_p8 = scmp.ne.s32.totalorder %s772_s22, 0 }
  0x8a   : > { %p781_p9 = scmp.ge.s32.totalorder %s530_s12, 2  ;;  %s250_s3 = scalar_lea.sflag [#allocation4], %s249_s30 }
  0x8c   : > { %p359_p0 = pnand %p781_p9, %p780_p8 }
  0x8e   : > { %513 = dma.done.wait (!%p359_p0), %s250_s3, 128  }
  0x8f   : > { %515 = vsyncadd (!%p359_p0), %s250_s3, 4294967168  ;;  %p18_p1 = scmp.ge.s32.totalorder %s575_s15, 4   ;;  %s782_s9 = smov %s522_s10 }
  0x90   : > { %s783_s10 = smov %s526_s11  ;;  %s784_s11 = smov %s587_s18 }
  0x91   : > { %s785_s12 = smov %s575_s15  ;;  %20 = sbr.rel (!%p18_p1) target bundleno = 7 (0x7), region = 86 }
  0x98   :  { %255 = vsyncpa [#allocation3], 1 }
  0x99   :  { %257 = vsyncpa [#allocation3 + $0x1], 1 }
  0x9a   :  { %258 = vsyncpa [#allocation6], 1 }
  0x9b   :  { %260 = vsyncpa [#allocation6 + $0x1], 1 }
  0x9c   :  { %261 = vsyncpa [#allocation4], 1 }
  0x9d   :  { %263 = vsyncpa [#allocation4 + $0x1], 1 }

</bundles_post_ra>
